<compile_context>
chip_gen: v6e
topology: v6e:2x2x1
jax: 0.10.0
libtpu: 0.0.40
codegen_flags: <defaults>
</compile_context>

<pallas_src>
import functools

import jax
import jax.numpy as jnp
from jax import lax
from jax.experimental import pallas as pl
from jax.experimental.pallas import tpu as pltpu


def _nlnet_v2_kernel(x_ref, aux_ref, w1_ref, b1_ref, wdw_ref, bdw_ref,
                     w2_ref, b2_ref, o_ref, *, W):
    Nb, C, HW = x_ref.shape
    Cm = w1_ref.shape[0]

    aux = aux_ref[...]              # (5, HW) constants (built once, host-side)
    inv_cnt = aux[0:1, :]           # 1 / valid-window-count (count_include_pad=False)
    mask_l = aux[1:2, :]            # col != 0
    mask_r = aux[2:3, :]            # col != W-1
    mask_u = aux[3:4, :]            # row != 0
    mask_d = aux[4:5, :]            # row != H-1

    w1 = w1_ref[...]                # (Cm, C)
    b1 = b1_ref[...]                # (Cm, 1)
    wdw = wdw_ref[...]              # (Cm, 9)   depthwise 3x3 flattened row-major
    bdw = bdw_ref[...]              # (Cm, 1)
    w2 = w2_ref[...]                # (C, Cm)
    b2 = b2_ref[...]                # (C, 1)

    for n in range(Nb):             # static unroll; Nb kept small by wrapper
        x = x_ref[n]                # (C, HW) lane-dense slab

        # ---- AvgPool2d(3, stride=1, pad=1, count_include_pad=False) ----
        # zero-padding emulated with lane rolls + edge masks; separable 3+3 sums
        xl = mask_l * pltpu.roll(x, 1, 1)           # in[row, col-1]
        xr = mask_r * pltpu.roll(x, HW - 1, 1)      # in[row, col+1]
        hs = x + xl + xr
        vs = (hs
              + mask_u * pltpu.roll(hs, W, 1)       # in[row-1, :]
              + mask_d * pltpu.roll(hs, HW - W, 1)) # in[row+1, :]
        pooled = vs * inv_cnt                       # (C, HW)

        # ---- mlp[0]: 1x1 conv C -> Cm  (tiny K: VPU broadcast-FMA, bias folded) ----
        h1 = w1[:, 0:1] * pooled[0:1, :] + b1
        for c in range(1, C):
            h1 = h1 + w1[:, c:c + 1] * pooled[c:c + 1, :]

        # ---- mlp[1]: depthwise 3x3 conv, pad=1, groups=Cm ----
        h1l = mask_l * pltpu.roll(h1, 1, 1)         # in[row, col-1]
        h1r = mask_r * pltpu.roll(h1, HW - 1, 1)    # in[row, col+1]

        def hconv(ki):              # horizontal 3-tap with kernel row ki
            return (wdw[:, 3 * ki + 0:3 * ki + 1] * h1l
                    + wdw[:, 3 * ki + 1:3 * ki + 2] * h1
                    + wdw[:, 3 * ki + 2:3 * ki + 3] * h1r)

        t0, t1, t2 = hconv(0), hconv(1), hconv(2)
        h2 = (t1 + bdw
              + mask_u * pltpu.roll(t0, W, 1)       # contribution from row-1
              + mask_d * pltpu.roll(t2, HW - W, 1)) # contribution from row+1

        # ---- mlp[2]: 1x1 conv Cm -> C (VPU broadcast-FMA, bias folded) ----
        h3 = w2[:, 0:1] * h2[0:1, :] + b2
        for m in range(1, Cm):
            h3 = h3 + w2[:, m:m + 1] * h2[m:m + 1, :]

        # ---- residual ----
        o_ref[n] = pooled + h3


def _pool_aux(H, W):
    """(5, H*W): [1/count, left-valid, right-valid, up-valid, down-valid]."""
    row = jnp.arange(H)
    col = jnp.arange(W)
    f32 = jnp.float32
    cnt_h = 3.0 - (row == 0).astype(f32) - (row == H - 1).astype(f32)
    cnt_w = 3.0 - (col == 0).astype(f32) - (col == W - 1).astype(f32)
    inv_cnt = (1.0 / (cnt_h[:, None] * cnt_w[None, :])).reshape(1, H * W)
    ml = jnp.tile((col != 0).astype(f32), H).reshape(1, H * W)
    mr = jnp.tile((col != W - 1).astype(f32), H).reshape(1, H * W)
    mu = jnp.repeat((row != 0).astype(f32), W).reshape(1, H * W)
    md = jnp.repeat((row != H - 1).astype(f32), W).reshape(1, H * W)
    return jnp.concatenate([inv_cnt, ml, mr, mu, md], axis=0)


def _choose_batch_block(N, C, Cm, HW):
    """Images per grid step: fill VMEM, keep >=2 grid steps, bound unrolling."""
    bytes_per_img = (2 * C + 8 * Cm) * HW * 4      # rough per-image working set
    cap = max(1, (8 << 20) // max(bytes_per_img, 1))
    cap = min(cap, 8)                               # bound static unroll
    if N >= 2:
        cap = min(cap, N // 2)                      # >=2 steps for v7x megacore
    cap = max(cap, 1)
    nb = 1
    for d in range(1, min(cap, N) + 1):
        if N % d == 0:
            nb = d
    return nb


def nlnet_v2_forward(x, params):
    """x: (N, C, H, W) float32."""
    w1, b1, wdw, bdw, w2, b2 = params
    N, C, H, W = x.shape
    Cm = w1.shape[0]
    HW = H * W

    x2 = x.reshape(N, C, HW)            # lane-dense I/O layout (last dim = H*W)
    wdw9 = wdw.reshape(Cm, 9)
    aux = _pool_aux(H, W)

    Nb = _choose_batch_block(N, C, Cm, HW)
    grid = (N // Nb,)

    kernel = functools.partial(_nlnet_v2_kernel, W=W)

    grid_spec = pltpu.PrefetchScalarGridSpec(
        num_scalar_prefetch=0,
        grid=grid,
        in_specs=[
            pl.BlockSpec((Nb, C, HW), lambda b: (b, 0, 0)),
            pl.BlockSpec((5, HW), lambda b: (0, 0)),
            pl.BlockSpec((Cm, C), lambda b: (0, 0)),
            pl.BlockSpec((Cm, 1), lambda b: (0, 0)),
            pl.BlockSpec((Cm, 9), lambda b: (0, 0)),
            pl.BlockSpec((Cm, 1), lambda b: (0, 0)),
            pl.BlockSpec((C, Cm), lambda b: (0, 0)),
            pl.BlockSpec((C, 1), lambda b: (0, 0)),
        ],
        out_specs=pl.BlockSpec((Nb, C, HW), lambda b: (b, 0, 0)),
    )

    out = pl.pallas_call(
        kernel,
        out_shape=jax.ShapeDtypeStruct((N, C, HW), jnp.float32),
        grid_spec=grid_spec,
        compiler_params=pltpu.CompilerParams(
            dimension_semantics=("parallel",),
            vmem_limit_bytes=32 * 1024 * 1024,
        ),
    )(x2, aux, w1, b1, wdw9, bdw, w2, b2)

    return out.reshape(N, C, H, W)


def nlnet_v2_reference(x, params):
    """Pure-JAX reference mirroring the PyTorch module semantics."""
    w1, b1, wdw, bdw, w2, b2 = params
    N, C, H, W = x.shape
    Cm = w1.shape[0]

    # AvgPool2d(3, stride=1, padding=1, count_include_pad=False)
    pad = ((0, 0), (0, 0), (1, 1), (1, 1))
    win = (1, 1, 3, 3)
    strides = (1, 1, 1, 1)
    sums = lax.reduce_window(x, 0.0, lax.add, win, strides, pad)
    counts = lax.reduce_window(jnp.ones_like(x), 0.0, lax.add, win, strides, pad)
    pooled = sums / counts

    dn = lax.conv_dimension_numbers(pooled.shape, (Cm, C, 1, 1), ("NCHW", "OIHW", "NCHW"))
    h1 = lax.conv_general_dilated(pooled, w1[:, :, None, None], (1, 1), "VALID",
                                  dimension_numbers=dn) + b1.reshape(1, Cm, 1, 1)
    dn_dw = lax.conv_dimension_numbers(h1.shape, (Cm, 1, 3, 3), ("NCHW", "OIHW", "NCHW"))
    h2 = lax.conv_general_dilated(h1, wdw[:, None, :, :], (1, 1), ((1, 1), (1, 1)),
                                  dimension_numbers=dn_dw,
                                  feature_group_count=Cm) + bdw.reshape(1, Cm, 1, 1)
    dn2 = lax.conv_dimension_numbers(h2.shape, (C, Cm, 1, 1), ("NCHW", "OIHW", "NCHW"))
    h3 = lax.conv_general_dilated(h2, w2[:, :, None, None], (1, 1), "VALID",
                                  dimension_numbers=dn2) + b2.reshape(1, C, 1, 1)
    return pooled + h3


def make_params(key, in_nc):
    channel = in_nc * 2
    ks = jax.random.split(key, 6)
    w1 = 0.1 * jax.random.normal(ks[0], (channel, in_nc), jnp.float32)
    b1 = 0.1 * jax.random.normal(ks[1], (channel, 1), jnp.float32)
    wdw = 0.1 * jax.random.normal(ks[2], (channel, 3, 3), jnp.float32)
    bdw = 0.1 * jax.random.normal(ks[3], (channel, 1), jnp.float32)
    w2 = 0.1 * jax.random.normal(ks[4], (in_nc, channel), jnp.float32)
    b2 = 0.1 * jax.random.normal(ks[5], (in_nc, 1), jnp.float32)
    return (w1, b1, wdw, bdw, w2, b2)


if __name__ == "__main__":
    key = jax.random.PRNGKey(0)
    k_x, k_p = jax.random.split(key)

    N, in_nc, H, W = 2, 3, 16, 16
    x = jax.random.normal(k_x, (N, in_nc, H, W), jnp.float32)
    params = make_params(k_p, in_nc)

    out = jax.block_until_ready(nlnet_v2_forward(x, params))
    ref = jax.block_until_ready(nlnet_v2_reference(x, params))

    assert out.shape == (N, in_nc, H, W)
    assert jnp.allclose(out, ref, atol=1e-4, rtol=1e-4), \
        f"max abs err {jnp.max(jnp.abs(out - ref))}"

    print("KERNEL_OK")
</pallas_src>

<mosaic_0001>
module attributes {stable_mosaic.version = 11 : i64} {
  func.func @_nlnet_v2_kernel(%arg0: i32, %arg1: memref<1x3x256xf32, #tpu.memory_space<vmem>>, %arg2: memref<5x256xf32, #tpu.memory_space<vmem>>, %arg3: memref<6x3xf32, #tpu.memory_space<vmem>>, %arg4: memref<6x1xf32, #tpu.memory_space<vmem>>, %arg5: memref<6x9xf32, #tpu.memory_space<vmem>>, %arg6: memref<6x1xf32, #tpu.memory_space<vmem>>, %arg7: memref<3x6xf32, #tpu.memory_space<vmem>>, %arg8: memref<3x1xf32, #tpu.memory_space<vmem>>, %arg9: memref<1x3x256xf32, #tpu.memory_space<vmem>>) attributes {dimension_semantics = [#tpu.dimension_semantics<parallel>], iteration_bounds = array<i64: 2>, scalar_prefetch = 0 : i64, scratch_operands = 0 : i64, tpu.core_type = #tpu.core_type<tc>, window_params = [{transform_indices = @transform_0, window_bounds = array<i64: 1, 3, 256>}, {pipeline_mode = #tpu.pipeline_mode<synchronous>, transform_indices = @transform_1, window_bounds = array<i64: 5, 256>}, {pipeline_mode = #tpu.pipeline_mode<synchronous>, transform_indices = @transform_2, window_bounds = array<i64: 6, 3>}, {pipeline_mode = #tpu.pipeline_mode<synchronous>, transform_indices = @transform_3, window_bounds = array<i64: 6, 1>}, {pipeline_mode = #tpu.pipeline_mode<synchronous>, transform_indices = @transform_4, window_bounds = array<i64: 6, 9>}, {pipeline_mode = #tpu.pipeline_mode<synchronous>, transform_indices = @transform_5, window_bounds = array<i64: 6, 1>}, {pipeline_mode = #tpu.pipeline_mode<synchronous>, transform_indices = @transform_6, window_bounds = array<i64: 3, 6>}, {pipeline_mode = #tpu.pipeline_mode<synchronous>, transform_indices = @transform_7, window_bounds = array<i64: 3, 1>}, {transform_indices = @transform_8, window_bounds = array<i64: 1, 3, 256>}]} {
    %c0 = arith.constant 0 : index
    %c0_0 = arith.constant 0 : index
    %0 = vector.load %arg2[%c0, %c0_0] : memref<5x256xf32, #tpu.memory_space<vmem>>, vector<5x256xf32>
    %1 = vector.extract_strided_slice %0 {offsets = [0, 0], sizes = [1, 256], strides = [1, 1]} : vector<5x256xf32> to vector<1x256xf32>
    %2 = vector.extract_strided_slice %0 {offsets = [1, 0], sizes = [1, 256], strides = [1, 1]} : vector<5x256xf32> to vector<1x256xf32>
    %3 = vector.extract_strided_slice %0 {offsets = [2, 0], sizes = [1, 256], strides = [1, 1]} : vector<5x256xf32> to vector<1x256xf32>
    %4 = vector.extract_strided_slice %0 {offsets = [3, 0], sizes = [1, 256], strides = [1, 1]} : vector<5x256xf32> to vector<1x256xf32>
    %5 = vector.extract_strided_slice %0 {offsets = [4, 0], sizes = [1, 256], strides = [1, 1]} : vector<5x256xf32> to vector<1x256xf32>
    %c0_1 = arith.constant 0 : index
    %c0_2 = arith.constant 0 : index
    %6 = vector.load %arg3[%c0_1, %c0_2] : memref<6x3xf32, #tpu.memory_space<vmem>>, vector<6x3xf32>
    %c0_3 = arith.constant 0 : index
    %c0_4 = arith.constant 0 : index
    %7 = vector.load %arg4[%c0_3, %c0_4] : memref<6x1xf32, #tpu.memory_space<vmem>>, vector<6x1xf32>
    %c0_5 = arith.constant 0 : index
    %c0_6 = arith.constant 0 : index
    %8 = vector.load %arg5[%c0_5, %c0_6] : memref<6x9xf32, #tpu.memory_space<vmem>>, vector<6x9xf32>
    %c0_7 = arith.constant 0 : index
    %c0_8 = arith.constant 0 : index
    %9 = vector.load %arg6[%c0_7, %c0_8] : memref<6x1xf32, #tpu.memory_space<vmem>>, vector<6x1xf32>
    %c0_9 = arith.constant 0 : index
    %c0_10 = arith.constant 0 : index
    %10 = vector.load %arg7[%c0_9, %c0_10] : memref<3x6xf32, #tpu.memory_space<vmem>>, vector<3x6xf32>
    %c0_11 = arith.constant 0 : index
    %c0_12 = arith.constant 0 : index
    %11 = vector.load %arg8[%c0_11, %c0_12] : memref<3x1xf32, #tpu.memory_space<vmem>>, vector<3x1xf32>
    %c0_13 = arith.constant 0 : index
    %c0_14 = arith.constant 0 : index
    %c0_15 = arith.constant 0 : index
    %12 = vector.load %arg1[%c0_13, %c0_14, %c0_15] : memref<1x3x256xf32, #tpu.memory_space<vmem>>, vector<1x3x256xf32>
    %13 = vector.shape_cast %12 : vector<1x3x256xf32> to vector<3x256xf32>
    %c1_i32 = arith.constant 1 : i32
    %14 = tpu.dynamic_rotate %13 by %c1_i32 dim 1 : vector<3x256xf32>, i32 -> vector<3x256xf32>
    %15 = vector.broadcast %2 : vector<1x256xf32> to vector<3x256xf32>
    %16 = arith.mulf %15, %14 : vector<3x256xf32>
    %c255_i32 = arith.constant 255 : i32
    %17 = tpu.dynamic_rotate %13 by %c255_i32 dim 1 : vector<3x256xf32>, i32 -> vector<3x256xf32>
    %18 = vector.broadcast %3 : vector<1x256xf32> to vector<3x256xf32>
    %19 = arith.mulf %18, %17 : vector<3x256xf32>
    %20 = arith.addf %13, %16 : vector<3x256xf32>
    %21 = arith.addf %20, %19 : vector<3x256xf32>
    %c16_i32 = arith.constant 16 : i32
    %22 = tpu.dynamic_rotate %21 by %c16_i32 dim 1 : vector<3x256xf32>, i32 -> vector<3x256xf32>
    %23 = vector.broadcast %4 : vector<1x256xf32> to vector<3x256xf32>
    %24 = arith.mulf %23, %22 : vector<3x256xf32>
    %25 = arith.addf %21, %24 : vector<3x256xf32>
    %c240_i32 = arith.constant 240 : i32
    %26 = tpu.dynamic_rotate %21 by %c240_i32 dim 1 : vector<3x256xf32>, i32 -> vector<3x256xf32>
    %27 = vector.broadcast %5 : vector<1x256xf32> to vector<3x256xf32>
    %28 = arith.mulf %27, %26 : vector<3x256xf32>
    %29 = arith.addf %25, %28 : vector<3x256xf32>
    %30 = vector.broadcast %1 : vector<1x256xf32> to vector<3x256xf32>
    %31 = arith.mulf %29, %30 : vector<3x256xf32>
    %32 = vector.extract_strided_slice %6 {offsets = [0, 0], sizes = [6, 1], strides = [1, 1]} : vector<6x3xf32> to vector<6x1xf32>
    %33 = vector.extract_strided_slice %31 {offsets = [0, 0], sizes = [1, 256], strides = [1, 1]} : vector<3x256xf32> to vector<1x256xf32>
    %34 = vector.broadcast %32 : vector<6x1xf32> to vector<6x256xf32>
    %35 = vector.broadcast %33 : vector<1x256xf32> to vector<6x256xf32>
    %36 = arith.mulf %34, %35 : vector<6x256xf32>
    %37 = vector.broadcast %7 : vector<6x1xf32> to vector<6x256xf32>
    %38 = arith.addf %36, %37 : vector<6x256xf32>
    %39 = vector.extract_strided_slice %6 {offsets = [0, 1], sizes = [6, 1], strides = [1, 1]} : vector<6x3xf32> to vector<6x1xf32>
    %40 = vector.extract_strided_slice %31 {offsets = [1, 0], sizes = [1, 256], strides = [1, 1]} : vector<3x256xf32> to vector<1x256xf32>
    %41 = vector.broadcast %39 : vector<6x1xf32> to vector<6x256xf32>
    %42 = vector.broadcast %40 : vector<1x256xf32> to vector<6x256xf32>
    %43 = arith.mulf %41, %42 : vector<6x256xf32>
    %44 = arith.addf %38, %43 : vector<6x256xf32>
    %45 = vector.extract_strided_slice %6 {offsets = [0, 2], sizes = [6, 1], strides = [1, 1]} : vector<6x3xf32> to vector<6x1xf32>
    %46 = vector.extract_strided_slice %31 {offsets = [2, 0], sizes = [1, 256], strides = [1, 1]} : vector<3x256xf32> to vector<1x256xf32>
    %47 = vector.broadcast %45 : vector<6x1xf32> to vector<6x256xf32>
    %48 = vector.broadcast %46 : vector<1x256xf32> to vector<6x256xf32>
    %49 = arith.mulf %47, %48 : vector<6x256xf32>
    %50 = arith.addf %44, %49 : vector<6x256xf32>
    %c1_i32_16 = arith.constant 1 : i32
    %51 = tpu.dynamic_rotate %50 by %c1_i32_16 dim 1 : vector<6x256xf32>, i32 -> vector<6x256xf32>
    %52 = vector.broadcast %2 : vector<1x256xf32> to vector<6x256xf32>
    %53 = arith.mulf %52, %51 : vector<6x256xf32>
    %c255_i32_17 = arith.constant 255 : i32
    %54 = tpu.dynamic_rotate %50 by %c255_i32_17 dim 1 : vector<6x256xf32>, i32 -> vector<6x256xf32>
    %55 = vector.broadcast %3 : vector<1x256xf32> to vector<6x256xf32>
    %56 = arith.mulf %55, %54 : vector<6x256xf32>
    %57 = vector.extract_strided_slice %8 {offsets = [0, 0], sizes = [6, 1], strides = [1, 1]} : vector<6x9xf32> to vector<6x1xf32>
    %58 = vector.broadcast %57 : vector<6x1xf32> to vector<6x256xf32>
    %59 = arith.mulf %58, %53 : vector<6x256xf32>
    %60 = vector.extract_strided_slice %8 {offsets = [0, 1], sizes = [6, 1], strides = [1, 1]} : vector<6x9xf32> to vector<6x1xf32>
    %61 = vector.broadcast %60 : vector<6x1xf32> to vector<6x256xf32>
    %62 = arith.mulf %61, %50 : vector<6x256xf32>
    %63 = arith.addf %59, %62 : vector<6x256xf32>
    %64 = vector.extract_strided_slice %8 {offsets = [0, 2], sizes = [6, 1], strides = [1, 1]} : vector<6x9xf32> to vector<6x1xf32>
    %65 = vector.broadcast %64 : vector<6x1xf32> to vector<6x256xf32>
    %66 = arith.mulf %65, %56 : vector<6x256xf32>
    %67 = arith.addf %63, %66 : vector<6x256xf32>
    %68 = vector.extract_strided_slice %8 {offsets = [0, 3], sizes = [6, 1], strides = [1, 1]} : vector<6x9xf32> to vector<6x1xf32>
    %69 = vector.broadcast %68 : vector<6x1xf32> to vector<6x256xf32>
    %70 = arith.mulf %69, %53 : vector<6x256xf32>
    %71 = vector.extract_strided_slice %8 {offsets = [0, 4], sizes = [6, 1], strides = [1, 1]} : vector<6x9xf32> to vector<6x1xf32>
    %72 = vector.broadcast %71 : vector<6x1xf32> to vector<6x256xf32>
    %73 = arith.mulf %72, %50 : vector<6x256xf32>
    %74 = arith.addf %70, %73 : vector<6x256xf32>
    %75 = vector.extract_strided_slice %8 {offsets = [0, 5], sizes = [6, 1], strides = [1, 1]} : vector<6x9xf32> to vector<6x1xf32>
    %76 = vector.broadcast %75 : vector<6x1xf32> to vector<6x256xf32>
    %77 = arith.mulf %76, %56 : vector<6x256xf32>
    %78 = arith.addf %74, %77 : vector<6x256xf32>
    %79 = vector.extract_strided_slice %8 {offsets = [0, 6], sizes = [6, 1], strides = [1, 1]} : vector<6x9xf32> to vector<6x1xf32>
    %80 = vector.broadcast %79 : vector<6x1xf32> to vector<6x256xf32>
    %81 = arith.mulf %80, %53 : vector<6x256xf32>
    %82 = vector.extract_strided_slice %8 {offsets = [0, 7], sizes = [6, 1], strides = [1, 1]} : vector<6x9xf32> to vector<6x1xf32>
    %83 = vector.broadcast %82 : vector<6x1xf32> to vector<6x256xf32>
    %84 = arith.mulf %83, %50 : vector<6x256xf32>
    %85 = arith.addf %81, %84 : vector<6x256xf32>
    %86 = vector.extract_strided_slice %8 {offsets = [0, 8], sizes = [6, 1], strides = [1, 1]} : vector<6x9xf32> to vector<6x1xf32>
    %87 = vector.broadcast %86 : vector<6x1xf32> to vector<6x256xf32>
    %88 = arith.mulf %87, %56 : vector<6x256xf32>
    %89 = arith.addf %85, %88 : vector<6x256xf32>
    %90 = vector.broadcast %9 : vector<6x1xf32> to vector<6x256xf32>
    %91 = arith.addf %78, %90 : vector<6x256xf32>
    %c16_i32_18 = arith.constant 16 : i32
    %92 = tpu.dynamic_rotate %67 by %c16_i32_18 dim 1 : vector<6x256xf32>, i32 -> vector<6x256xf32>
    %93 = vector.broadcast %4 : vector<1x256xf32> to vector<6x256xf32>
    %94 = arith.mulf %93, %92 : vector<6x256xf32>
    %95 = arith.addf %91, %94 : vector<6x256xf32>
    %c240_i32_19 = arith.constant 240 : i32
    %96 = tpu.dynamic_rotate %89 by %c240_i32_19 dim 1 : vector<6x256xf32>, i32 -> vector<6x256xf32>
    %97 = vector.broadcast %5 : vector<1x256xf32> to vector<6x256xf32>
    %98 = arith.mulf %97, %96 : vector<6x256xf32>
    %99 = arith.addf %95, %98 : vector<6x256xf32>
    %100 = vector.extract_strided_slice %10 {offsets = [0, 0], sizes = [3, 1], strides = [1, 1]} : vector<3x6xf32> to vector<3x1xf32>
    %101 = vector.extract_strided_slice %99 {offsets = [0, 0], sizes = [1, 256], strides = [1, 1]} : vector<6x256xf32> to vector<1x256xf32>
    %102 = vector.broadcast %100 : vector<3x1xf32> to vector<3x256xf32>
    %103 = vector.broadcast %101 : vector<1x256xf32> to vector<3x256xf32>
    %104 = arith.mulf %102, %103 : vector<3x256xf32>
    %105 = vector.broadcast %11 : vector<3x1xf32> to vector<3x256xf32>
    %106 = arith.addf %104, %105 : vector<3x256xf32>
    %107 = vector.extract_strided_slice %10 {offsets = [0, 1], sizes = [3, 1], strides = [1, 1]} : vector<3x6xf32> to vector<3x1xf32>
    %108 = vector.extract_strided_slice %99 {offsets = [1, 0], sizes = [1, 256], strides = [1, 1]} : vector<6x256xf32> to vector<1x256xf32>
    %109 = vector.broadcast %107 : vector<3x1xf32> to vector<3x256xf32>
    %110 = vector.broadcast %108 : vector<1x256xf32> to vector<3x256xf32>
    %111 = arith.mulf %109, %110 : vector<3x256xf32>
    %112 = arith.addf %106, %111 : vector<3x256xf32>
    %113 = vector.extract_strided_slice %10 {offsets = [0, 2], sizes = [3, 1], strides = [1, 1]} : vector<3x6xf32> to vector<3x1xf32>
    %114 = vector.extract_strided_slice %99 {offsets = [2, 0], sizes = [1, 256], strides = [1, 1]} : vector<6x256xf32> to vector<1x256xf32>
    %115 = vector.broadcast %113 : vector<3x1xf32> to vector<3x256xf32>
    %116 = vector.broadcast %114 : vector<1x256xf32> to vector<3x256xf32>
    %117 = arith.mulf %115, %116 : vector<3x256xf32>
    %118 = arith.addf %112, %117 : vector<3x256xf32>
    %119 = vector.extract_strided_slice %10 {offsets = [0, 3], sizes = [3, 1], strides = [1, 1]} : vector<3x6xf32> to vector<3x1xf32>
    %120 = vector.extract_strided_slice %99 {offsets = [3, 0], sizes = [1, 256], strides = [1, 1]} : vector<6x256xf32> to vector<1x256xf32>
    %121 = vector.broadcast %119 : vector<3x1xf32> to vector<3x256xf32>
    %122 = vector.broadcast %120 : vector<1x256xf32> to vector<3x256xf32>
    %123 = arith.mulf %121, %122 : vector<3x256xf32>
    %124 = arith.addf %118, %123 : vector<3x256xf32>
    %125 = vector.extract_strided_slice %10 {offsets = [0, 4], sizes = [3, 1], strides = [1, 1]} : vector<3x6xf32> to vector<3x1xf32>
    %126 = vector.extract_strided_slice %99 {offsets = [4, 0], sizes = [1, 256], strides = [1, 1]} : vector<6x256xf32> to vector<1x256xf32>
    %127 = vector.broadcast %125 : vector<3x1xf32> to vector<3x256xf32>
    %128 = vector.broadcast %126 : vector<1x256xf32> to vector<3x256xf32>
    %129 = arith.mulf %127, %128 : vector<3x256xf32>
    %130 = arith.addf %124, %129 : vector<3x256xf32>
    %131 = vector.extract_strided_slice %10 {offsets = [0, 5], sizes = [3, 1], strides = [1, 1]} : vector<3x6xf32> to vector<3x1xf32>
    %132 = vector.extract_strided_slice %99 {offsets = [5, 0], sizes = [1, 256], strides = [1, 1]} : vector<6x256xf32> to vector<1x256xf32>
    %133 = vector.broadcast %131 : vector<3x1xf32> to vector<3x256xf32>
    %134 = vector.broadcast %132 : vector<1x256xf32> to vector<3x256xf32>
    %135 = arith.mulf %133, %134 : vector<3x256xf32>
    %136 = arith.addf %130, %135 : vector<3x256xf32>
    %137 = arith.addf %31, %136 : vector<3x256xf32>
    %c0_20 = arith.constant 0 : index
    %c0_21 = arith.constant 0 : index
    %c0_22 = arith.constant 0 : index
    %138 = vector.load %arg9[%c0_20, %c0_21, %c0_22] : memref<1x3x256xf32, #tpu.memory_space<vmem>>, vector<1x3x256xf32>
    %139 = vector.shape_cast %138 : vector<1x3x256xf32> to vector<3x256xf32>
    %140 = vector.shape_cast %137 : vector<3x256xf32> to vector<1x3x256xf32>
    tpu.vector_store %arg9[%c0_20, %c0_21, %c0_22], %140 {strides = array<i32>} : memref<1x3x256xf32, #tpu.memory_space<vmem>>, vector<1x3x256xf32>,
    return
  }
  func.func @transform_0(%arg0: i32) -> (i32, i32, i32) {
    %c0_i32 = arith.constant 0 : i32
    %c0_i32_0 = arith.constant 0 : i32
    %c0_i32_1 = arith.constant 0 : i32
    return %arg0, %c0_i32, %c0_i32_0 : i32, i32, i32
  }
  func.func @transform_1(%arg0: i32) -> (i32, i32) {
    %c0_i32 = arith.constant 0 : i32
    %c0_i32_0 = arith.constant 0 : i32
    %c0_i32_1 = arith.constant 0 : i32
    return %c0_i32, %c0_i32_0 : i32, i32
  }
  func.func @transform_2(%arg0: i32) -> (i32, i32) {
    %c0_i32 = arith.constant 0 : i32
    %c0_i32_0 = arith.constant 0 : i32
    %c0_i32_1 = arith.constant 0 : i32
    return %c0_i32, %c0_i32_0 : i32, i32
  }
  func.func @transform_3(%arg0: i32) -> (i32, i32) {
    %c0_i32 = arith.constant 0 : i32
    %c0_i32_0 = arith.constant 0 : i32
    %c0_i32_1 = arith.constant 0 : i32
    return %c0_i32, %c0_i32_0 : i32, i32
  }
  func.func @transform_4(%arg0: i32) -> (i32, i32) {
    %c0_i32 = arith.constant 0 : i32
    %c0_i32_0 = arith.constant 0 : i32
    %c0_i32_1 = arith.constant 0 : i32
    return %c0_i32, %c0_i32_0 : i32, i32
  }
  func.func @transform_5(%arg0: i32) -> (i32, i32) {
    %c0_i32 = arith.constant 0 : i32
    %c0_i32_0 = arith.constant 0 : i32
    %c0_i32_1 = arith.constant 0 : i32
    return %c0_i32, %c0_i32_0 : i32, i32
  }
  func.func @transform_6(%arg0: i32) -> (i32, i32) {
    %c0_i32 = arith.constant 0 : i32
    %c0_i32_0 = arith.constant 0 : i32
    %c0_i32_1 = arith.constant 0 : i32
    return %c0_i32, %c0_i32_0 : i32, i32
  }
  func.func @transform_7(%arg0: i32) -> (i32, i32) {
    %c0_i32 = arith.constant 0 : i32
    %c0_i32_0 = arith.constant 0 : i32
    %c0_i32_1 = arith.constant 0 : i32
    return %c0_i32, %c0_i32_0 : i32, i32
  }
  func.func @transform_8(%arg0: i32) -> (i32, i32, i32) {
    %c0_i32 = arith.constant 0 : i32
    %c0_i32_0 = arith.constant 0 : i32
    %c0_i32_1 = arith.constant 0 : i32
    return %arg0, %c0_i32, %c0_i32_0 : i32, i32, i32
  }
}

</mosaic_0001>

<bundles_post_ra>
// kernel: tpu_custom_call.1
= control target key start
LH: loop header
LB: loop body
LE: loop exit
PB: predicated region body
PF: predicated region fallthrough
CT: control target
= control target key end

     0   :  { %s903_s27 = smov 0   ;;  %s1164_s0 = inlined_call_operand.vmem [shape: f32[2,3,256], index: 0, kind: input, shape index: {}]   ;;  %s1165_s1 = inlined_call_operand.vmem [shape: f32[5,256], index: 1, kind: input, shape index: {}]   ;;  %s1166_s2 = inlined_call_operand.vmem [shape: f32[6,3], index: 2, kind: input, shape index: {}]   ;;  %s1167_s3 = inlined_call_operand.vmem [shape: f32[6,1], index: 3, kind: input, shape index: {}]   ;;  %s1168_s4 = inlined_call_operand.vmem [shape: f32[6,9], index: 4, kind: input, shape index: {}]   ;;  %s1169_s5 = inlined_call_operand.vmem [shape: f32[6,1], index: 5, kind: input, shape index: {}]   ;;  %s1170_s6 = inlined_call_operand.vmem [shape: f32[3,6], index: 6, kind: input, shape index: {}]   ;;  %s1171_s7 = inlined_call_operand.vmem [shape: f32[3,1], index: 7, kind: input, shape index: {}]   ;;  %s1172_s8 = inlined_call_operand.vmem [shape: f32[2,3,256], index: 8, kind: output, shape index: {}]  }
   0x1 LB: > { %s782_s28 = sadd.s32 4294967295, %s843_s27   ;;  %p786_p0 = scmp.ge.s32.totalorder %s843_s27, 1  ;;  %s843_s27 = sphi %s903_s27, %s18_s27  }
   0x2   : > { %p262_p1 = scmp.lt.s32.totalorder %s843_s27, 3 }
   0x4   : > { %p263_p2 = pnand %p786_p0, %p262_p1 }
   0x5   : > { %p296_p3 = scmp.lt.s32.totalorder (!%p263_p2), %s782_s28, 1  ;;  %s845_s11 = smov (!%p263_p2), 127  }
   0x6   : > { %266 = sbr.rel (%p263_p2) target bundleno = 574 (0x23e), region = 52  ;;  %s846_s12 = smov (!%p263_p2), 1  }
   0x7   : > { %s848_s17 = smov (!%p263_p2), 16   ;;  %s849_s18 = smov (!%p263_p2), 112  }
   0xb   : > { %s1174_s28 = smov (!%p296_p3, %s782_s28), 1  ;;  %v847_v2 = vmov 0   ;;  %v322_v3 = vlaneseq  ;;  %v938_v8 = vld [vmem:[%s1165_s1] sm:$0x1f]  ;;  %v943_v9 = vld [vmem:[%s1165_s1 + $0x8] sm:$0x1f] }
   0xc   : > { %s793_s29 = sshll.u32 %s1174_s28, 3  ;;  %816 = vset.pattern.permute.xlu0 %v847_v2  ;;  %817 = vset.pattern.permute.xlu1 %v847_v2  ;;  %v308_v31 = vld [vmem:[%s1166_s2] sm:$0x3f]  ;;  %v850_v33 = vmov 2   ;;  %v851_v34 = vmov 1   ;;  %v852_v36 = vmov 7  }
   0xd   : > { %s300_s10 = scalar_lea.vmem %s1164_s0, %s793_s29  ;;  %v925_v4 = vshrl.u32 %v322_v3, 7  ;;  %v927_v5 = vand.u32 127, %v322_v3  ;;  %v309_v32 = vld [vmem:[%s1167_s3] sm:$0x3f]  ;;  %v853_v37 = vmov 8   ;;  %v854_v38 = vmov 6   ;;  %s305_s14 = scalar_lea.vmem %s1172_s8, %s793_s29 }
   0xe   : > { %v314_v0 = vld [vmem:[%s300_s10] sm:$0x77]  ;;  %v855_v39 = vmov 3  }
   0xf   : > { %337 = vrot.lane.b32.xlu1 %v314_v0, %s845_s11  ;;  %318 = vrot.lane.b32.xlu0 %v314_v0, %s846_s12  ;;  %v316_v1 = vcombine.high %v314_v0, %v314_v0  ;;  %v930_v6 = vsub.s32 2, %v925_v4  ;;  %v933_v7 = vsub.s32 1, %v925_v4  ;;  %vm341_vm0 = vcmp.lt.s32.totalorder %v927_v5, 127  ;;  %v990_v35 = vld [vmem:[%s1168_s4] sm:$0x3f] }
  0x10   : > { %vm324_vm1 = vcmp.lt.s32.totalorder %v927_v5, 1  ;;  %v1001_v40 = vsub.s32 3, %v925_v4  ;;  %vm371_vm2 = vcmp.lt.s32.totalorder %v927_v5, 16  ;;  %v1013_v44 = vsub.s32 4, %v925_v4 }
  0x11   : > { %v949_v12 = vrot.slane %v938_v8, %v930_v6  ;;  %v953_v13 = vrot.slane %v943_v9, %v930_v6  ;;  %v957_v14 = vrot.slane %v938_v8, %v933_v7  ;;  %v961_v15 = vrot.slane %v943_v9, %v933_v7 }
  0x12   : > { %v1006_v42 = vrot.slane %v938_v8, %v1001_v40  ;;  %v1010_v43 = vrot.slane %v943_v9, %v1001_v40  ;;  %v1016_v46 = vsub.s32 0, %v925_v4  ;;  %vm393_vm3 = vcmp.lt.s32.totalorder %v927_v5, 112 }
  0x13   : > { %339 = vrot.lane.b32.xlu1 %v316_v1, %s845_s11  ;;  %320 = vrot.lane.b32.xlu0 %v316_v1, %s846_s12  ;;  %v1027_v51 = vrot.slane %v938_v8, %v1013_v44  ;;  %v1031_v52 = vrot.slane %v943_v9, %v1013_v44 }
  0x14   : > { %v414_v55 = vrot.slane %v938_v8, %v1016_v46  ;;  %v418_v56 = vrot.slane %v943_v9, %v1016_v46  ;;  %v1046_v8 = vsub.s32 5, %v925_v4 }
  0x16   : > { %v421_v63 = vcombine.low %v414_v55, %v418_v56  ;;  %v1092_v55 = vld [vmem:[%s1170_s6] sm:$0x7] }
  0x81   : > { %v338_v10 = vpop.permute.xlu1 %337  ;;  %v319_v11 = vpop.permute.xlu0 %318 }
  0x85   : > { %v340_v16 = vpop.permute.xlu1 %339  ;;  %v321_v17 = vpop.permute.xlu0 %320 }
  0x86   : > { %v342_v18 = vsel %vm341_vm0, %v338_v10, %v340_v16  ;;  %v343_v19 = vsel %vm341_vm0, %v340_v16, %v338_v10  ;;  %v325_v20 = vsel %vm324_vm1, %v319_v11, %v321_v17  ;;  %v326_v21 = vsel %vm324_vm1, %v321_v17, %v319_v11 }
  0x87   : > { %v352_v22 = vmul.f32 %v949_v12, %v342_v18  ;;  %v353_v23 = vmul.f32 %v953_v13, %v343_v19  ;;  %v335_v24 = vmul.f32 %v957_v14, %v326_v21  ;;  %v336_v25 = vmul.f32 %v961_v15, %v325_v20 }
  0x88   : > { %v493_v11 = vsub.s32 6, %v925_v4 }
  0x89   : > { %v356_v26 = vcombine.low %v335_v24, %v336_v25  ;;  %v361_v27 = vcombine.low %v352_v22, %v353_v23 }
  0x8b   : > { %v358_v28 = vadd.f32 %v356_v26, %v314_v0 }
  0x8d   : > { %v363_v29 = vadd.f32 %v361_v27, %v358_v28 }
  0x8f   : > { %367 = vrot.lane.b32.xlu0 %v363_v29, %s848_s17  ;;  %v365_v30 = vcombine.high %v363_v29, %v363_v29 }
  0x91   : > { %369 = vrot.lane.b32.xlu1 %v365_v30, %s848_s17 }
  0x93   : > { %389 = vrot.lane.b32.xlu0 %v363_v29, %s849_s18 }
  0x95   : > { %391 = vrot.lane.b32.xlu1 %v365_v30, %s849_s18 }
  0x97   : > { %426 = vperm.xlu0 %816, %v308_v31  }
  0x99   : > { %452 = vperm.xlu1 %817, %v309_v32  }
  0x9b   : > { %819 = vset.pattern.permute.xlu0 %v850_v33 }
  0x9c   : > { %484 = vperm.xlu0 %819, %v308_v31  }
  0x9d   : > { %818 = vset.pattern.permute.xlu1 %v851_v34 }
  0x9e   : > { %458 = vperm.xlu1 %818, %v308_v31  }
  0xa0   : > { %541 = vperm.xlu0 %819, %v990_v35  }
  0xa2   : > { %820 = vset.pattern.permute.xlu1 %v847_v2 }
  0xa3   : > { %527 = vperm.xlu1 %820, %v990_v35  }
  0xa4   : > { %823 = vset.pattern.permute.xlu0 %v852_v36 }
  0xa5   : > { %577 = vperm.xlu0 %823, %v990_v35  }
  0xa7   : > { %821 = vset.pattern.permute.xlu1 %v851_v34 }
  0xa8   : > { %533 = vperm.xlu1 %821, %v990_v35  }
  0xa9   : > { %824 = vset.pattern.permute.xlu0 %v853_v37 }
  0xac   : > { %822 = vset.pattern.permute.xlu1 %v854_v38 }
  0xad   : > { %571 = vperm.xlu1 %822, %v990_v35  }
  0xb1   : > { %825 = vset.pattern.permute.xlu1 %v855_v39 }
 0x101   : > { %v368_v41 = vpop.permute.xlu0 %367 }
 0x103   : > { %v370_v45 = vpop.permute.xlu1 %369 }
 0x104   : > { %v372_v47 = vsel %vm371_vm2, %v368_v41, %v370_v45  ;;  %v373_v48 = vsel %vm371_vm2, %v370_v45, %v368_v41 }
 0x105   : > { %v382_v49 = vmul.f32 %v1006_v42, %v373_v48  ;;  %v383_v50 = vmul.f32 %v1010_v43, %v372_v47  ;;  %v390_v54 = vpop.permute.xlu0 %389 }
 0x107   : > { %v386_v53 = vcombine.low %v382_v49, %v383_v50  ;;  %v392_v57 = vpop.permute.xlu1 %391  ;;  %v856_v50 = vmov 5  }
 0x108   : > { %v394_v58 = vsel %vm393_vm3, %v390_v54, %v392_v57  ;;  %v395_v59 = vsel %vm393_vm3, %v392_v57, %v390_v54  ;;  %v311_v54 = vld [vmem:[%s1169_s5] sm:$0x3f] }
 0x109   : > { %v404_v60 = vmul.f32 %v1027_v51, %v394_v58  ;;  %v405_v61 = vmul.f32 %v1031_v52, %v395_v59  ;;  %v388_v62 = vadd.f32 %v386_v53, %v363_v29  ;;  %v857_v53 = vmov 4  }
 0x10b   : > { %v408_v0 = vcombine.low %v404_v60, %v405_v61 }
 0x10d   : > { %v410_v1 = vadd.f32 %v408_v0, %v388_v62 }
 0x10f   : > { %v1043_v3 = vmul.f32 %v421_v63, %v410_v1 }
 0x111   : > { %v433_v9 = vrot.slane %v1043_v3, %v1016_v46  ;;  %v437_v10 = vrot.slane %v1043_v3, %v1013_v44  ;;  %v464_v20 = vrot.slane %v1043_v3, %v933_v7  ;;  %v468_v21 = vrot.slane %v1043_v3, %v1046_v8 }
 0x112   : > { %v427_v16 = vpop.permute.xlu0 %426  ;;  %v490_v22 = vrot.slane %v1043_v3, %v930_v6  ;;  %v494_v23 = vrot.slane %v1043_v3, %v493_v11 }
 0x113   : > { %v443_v17 = vrot.slane %v433_v9, %v1016_v46  ;;  %v447_v18 = vrot.slane %v437_v10, %v1016_v46  ;;  %v474_v4 = vrot.slane %v464_v20, %v933_v7  ;;  %v478_v26 = vrot.slane %v468_v21, %v933_v7 }
 0x114   : > { %v453_v19 = vpop.permute.xlu1 %452  ;;  %v500_v28 = vrot.slane %v490_v22, %v930_v6  ;;  %v504_v29 = vrot.slane %v494_v23, %v930_v6 }
 0x115   : > { %v448_v24 = vmul.f32 %v443_v17, %v427_v16  ;;  %v449_v25 = vmul.f32 %v447_v18, %v427_v16 }
 0x117   : > { %v485_v27 = vpop.permute.xlu0 %484  ;;  %v455_v31 = vadd.f32 %v453_v19, %v448_v24  ;;  %v456_v32 = vadd.f32 %v453_v19, %v449_v25 }
 0x118   : > { %v505_v38 = vmul.f32 %v500_v28, %v485_v27  ;;  %v506_v41 = vmul.f32 %v504_v29, %v485_v27 }
 0x119   : > { %v459_v30 = vpop.permute.xlu1 %458 }
 0x11a   : > { %v479_v36 = vmul.f32 %v474_v4, %v459_v30  ;;  %v480_v37 = vmul.f32 %v478_v26, %v459_v30 }
 0x11b   : > { %v542_v57 = vpop.permute.xlu0 %541 }
 0x11c   : > { %v481_v45 = vadd.f32 %v479_v36, %v455_v31  ;;  %v482_v47 = vadd.f32 %v480_v37, %v456_v32  ;;  %v313_v37 = vld [vmem:[%s1171_s7] sm:$0x7] }
 0x11e   : > { %v1066_v48 = vadd.f32 %v505_v38, %v481_v45  ;;  %v1068_v49 = vadd.f32 %v506_v41, %v482_v47  ;;  %v528_v56 = vpop.permute.xlu1 %527 }
 0x120   : > { %511 = vrot.lane.b32.xlu1 %v1068_v49, %s846_s12  ;;  %509 = vrot.lane.b32.xlu0 %v1066_v48, %s846_s12  ;;  %v578_v59 = vpop.permute.xlu0 %577 }
 0x121   : > { %v580_v25 = vmul.f32 %v578_v59, %v1066_v48  ;;  %v581_v4 = vmul.f32 %v578_v59, %v1068_v49 }
 0x123   : > { %v534_v58 = vpop.permute.xlu1 %533 }
 0x124   : > { %517 = vrot.lane.b32.xlu1 %v1066_v48, %s845_s11  ;;  %585 = vperm.xlu0 %824, %v990_v35   ;;  %v536_v17 = vmul.f32 %v534_v58, %v1066_v48  ;;  %v537_v18 = vmul.f32 %v534_v58, %v1068_v49 }
 0x128   : > { %519 = vrot.lane.b32.xlu1 %v1068_v49, %s845_s11  ;;  %827 = vset.pattern.permute.xlu0 %v856_v50 }
 0x129   : > { %563 = vperm.xlu0 %827, %v990_v35  }
 0x12c   : > { %549 = vperm.xlu1 %825, %v990_v35  }
 0x12d   : > { %829 = vset.pattern.permute.xlu0 %v847_v2 }
 0x130   : > { %826 = vset.pattern.permute.xlu1 %v857_v53 }
 0x131   : > { %555 = vperm.xlu1 %826, %v990_v35   ;;  %v572_v35 = vpop.permute.xlu1 %571 }
 0x135   : > { %828 = vset.pattern.permute.xlu1 %v847_v2 }
 0x136   : > { %594 = vperm.xlu1 %828, %v311_v54  }
 0x13a   : > { %621 = vperm.xlu1 %828, %v1092_v55  }
 0x13e   : > { %830 = vset.pattern.permute.xlu1 %v851_v34 }
 0x192   : > { %v510_v60 = vpop.permute.xlu0 %509  ;;  %v512_v61 = vpop.permute.xlu1 %511 }
 0x193   : > { %v513_v2 = vsel %vm324_vm1, %v510_v60, %v512_v61  ;;  %v514_v62 = vsel %vm324_vm1, %v512_v61, %v510_v60 }
 0x194   : > { %v515_v63 = vmul.f32 %v514_v62, %v957_v14  ;;  %v516_v0 = vmul.f32 %v513_v2, %v961_v15 }
 0x196   : > { %v518_v1 = vpop.permute.xlu1 %517  ;;  %v530_v9 = vmul.f32 %v528_v56, %v515_v63  ;;  %v531_v34 = vmul.f32 %v528_v56, %v516_v0  ;;  %v574_v20 = vmul.f32 %v572_v35, %v515_v63  ;;  %v575_v15 = vmul.f32 %v572_v35, %v516_v0 }
 0x198   : > { %v539_v21 = vadd.f32 %v537_v18, %v531_v34  ;;  %v538_v23 = vadd.f32 %v536_v17, %v530_v9  ;;  %v582_v31 = vadd.f32 %v580_v25, %v574_v20  ;;  %v583_v32 = vadd.f32 %v581_v4, %v575_v15 }
 0x19a   : > { %v520_v10 = vpop.permute.xlu1 %519 }
 0x19b   : > { %v521_v11 = vsel %vm341_vm0, %v518_v1, %v520_v10  ;;  %v522_v16 = vsel %vm341_vm0, %v520_v10, %v518_v1 }
 0x19c   : > { %v523_v19 = vmul.f32 %v521_v11, %v949_v12  ;;  %v524_v14 = vmul.f32 %v522_v16, %v953_v13 }
 0x19e   : > { %v545_v22 = vmul.f32 %v542_v57, %v524_v14  ;;  %v544_v24 = vmul.f32 %v542_v57, %v523_v19 }
 0x19f   : > { %v586_v26 = vpop.permute.xlu0 %585 }
 0x1a0   : > { %v588_v27 = vmul.f32 %v586_v26, %v523_v19  ;;  %v589_v28 = vmul.f32 %v586_v26, %v524_v14  ;;  %v547_v29 = vadd.f32 %v545_v22, %v539_v21  ;;  %v546_v30 = vadd.f32 %v544_v24, %v538_v23 }
 0x1a2   : > { %601 = vrot.lane.b32.xlu0 %v547_v29, %s848_s17  ;;  %599 = vrot.lane.b32.xlu1 %v546_v30, %s848_s17  ;;  %v590_v12 = vadd.f32 %v588_v27, %v582_v31  ;;  %v591_v13 = vadd.f32 %v589_v28, %v583_v32 }
 0x1a4   : > { %v564_v38 = vpop.permute.xlu0 %563 }
 0x1a5   : > { %v566_v57 = vmul.f32 %v564_v38, %v523_v19  ;;  %v567_v58 = vmul.f32 %v564_v38, %v524_v14 }
 0x1a6   : > { %611 = vrot.lane.b32.xlu0 %v591_v13, %s849_s18  ;;  %609 = vrot.lane.b32.xlu1 %v590_v12, %s849_s18 }
 0x1a7   : > { %v550_v36 = vpop.permute.xlu1 %549 }
 0x1a8   : > { %v552_v45 = vmul.f32 %v550_v36, %v515_v63  ;;  %v553_v47 = vmul.f32 %v550_v36, %v516_v0 }
 0x1aa   : > { %636 = vperm.xlu0 %829, %v313_v37   ;;  %642 = vperm.xlu1 %830, %v1092_v55  }
 0x1ac   : > { %v556_v41 = vpop.permute.xlu1 %555 }
 0x1ad   : > { %v558_v54 = vmul.f32 %v556_v41, %v1066_v48  ;;  %v559_v56 = vmul.f32 %v556_v41, %v1068_v49 }
 0x1ae   : > { %832 = vset.pattern.permute.xlu0 %v855_v39  ;;  %831 = vset.pattern.permute.xlu1 %v850_v33 }
 0x1af   : > { %v560_v35 = vadd.f32 %v558_v54, %v552_v45  ;;  %v561_v59 = vadd.f32 %v559_v56, %v553_v47  ;;  %674 = vperm.xlu0 %832, %v1092_v55   ;;  %658 = vperm.xlu1 %831, %v1092_v55  }
 0x1b1   : > { %v568_v60 = vadd.f32 %v566_v57, %v560_v35  ;;  %v569_v61 = vadd.f32 %v567_v58, %v561_v59  ;;  %v595_v33 = vpop.permute.xlu1 %594 }
 0x1b3   : > { %833 = vset.pattern.permute.xlu1 %v857_v53  ;;  %835 = vset.pattern.permute.xlu0 %v856_v50  ;;  %v597_v9 = vadd.f32 %v595_v33, %v568_v60 }
 0x1b4   : > { %690 = vperm.xlu1 %833, %v1092_v55  }
 0x1b5   : > { %v622_v39 = vpop.permute.xlu1 %621 }
 0x1b8   : > { %834 = vset.pattern.permute.xlu1 %v856_v50  ;;  %v598_v50 = vadd.f32 %v595_v33, %v569_v61 }
 0x1b9   : > { %706 = vperm.xlu1 %834, %v1092_v55  }
 0x214   : > { %v602_v48 = vpop.permute.xlu0 %601  ;;  %v600_v49 = vpop.permute.xlu1 %599 }
 0x215   : > { %v603_v2 = vsel %vm371_vm2, %v600_v49, %v602_v48  ;;  %v604_v62 = vsel %vm371_vm2, %v602_v48, %v600_v49 }
 0x216   : > { %v605_v53 = vmul.f32 %v604_v62, %v1006_v42  ;;  %v606_v63 = vmul.f32 %v603_v2, %v1010_v43 }
 0x218   : > { %v612_v0 = vpop.permute.xlu0 %611  ;;  %v610_v1 = vpop.permute.xlu1 %609  ;;  %v607_v16 = vadd.f32 %v605_v53, %v597_v9  ;;  %v608_v17 = vadd.f32 %v606_v63, %v598_v50 }
 0x219   : > { %v613_v55 = vsel %vm393_vm3, %v610_v1, %v612_v0  ;;  %v614_v34 = vsel %vm393_vm3, %v612_v0, %v610_v1 }
 0x21a   : > { %v615_v10 = vmul.f32 %v613_v55, %v1027_v51  ;;  %v616_v11 = vmul.f32 %v614_v34, %v1031_v52 }
 0x21c   : > { %v617_v18 = vadd.f32 %v615_v10, %v607_v16  ;;  %v618_v42 = vadd.f32 %v616_v11, %v608_v17 }
 0x21e   : > { %v627_v43 = vrot.slane %v617_v18, %v1016_v46  ;;  %v631_v19 = vrot.slane %v618_v42, %v1016_v46  ;;  %v648_v21 = vrot.slane %v617_v18, %v933_v7  ;;  %v652_v5 = vrot.slane %v618_v42, %v933_v7 }
 0x21f   : > { %v664_v25 = vrot.slane %v617_v18, %v930_v6  ;;  %v668_v4 = vrot.slane %v618_v42, %v930_v6  ;;  %v680_v31 = vrot.slane %v617_v18, %v1001_v40  ;;  %v684_v32 = vrot.slane %v618_v42, %v1001_v40 }
 0x220   : > { %v632_v20 = vmul.f32 %v627_v43, %v622_v39  ;;  %v633_v15 = vmul.f32 %v631_v19, %v622_v39  ;;  %v696_v37 = vrot.slane %v617_v18, %v1013_v44  ;;  %v700_v38 = vrot.slane %v618_v42, %v1013_v44 }
 0x221   : > { %v712_v56 = vrot.slane %v617_v18, %v1046_v8  ;;  %v716_v57 = vrot.slane %v618_v42, %v1046_v8 }
 0x225   : > { %v637_v14 = vpop.permute.xlu0 %636  ;;  %v643_v22 = vpop.permute.xlu1 %642 }
 0x226   : > { %v639_v23 = vadd.f32 %v637_v14, %v632_v20  ;;  %v640_v51 = vadd.f32 %v637_v14, %v633_v15  ;;  %v653_v24 = vmul.f32 %v648_v21, %v643_v22  ;;  %v654_v52 = vmul.f32 %v652_v5, %v643_v22 }
 0x228   : > { %v655_v27 = vadd.f32 %v653_v24, %v639_v23  ;;  %v656_v28 = vadd.f32 %v654_v52, %v640_v51 }
 0x22a   : > { %v659_v26 = vpop.permute.xlu1 %658  ;;  %v675_v30 = vpop.permute.xlu0 %674 }
 0x22b   : > { %v669_v46 = vmul.f32 %v664_v25, %v659_v26  ;;  %v670_v29 = vmul.f32 %v668_v4, %v659_v26  ;;  %v685_v13 = vmul.f32 %v680_v31, %v675_v30  ;;  %v686_v36 = vmul.f32 %v684_v32, %v675_v30 }
 0x22d   : > { %v671_v7 = vadd.f32 %v669_v46, %v655_v27  ;;  %v672_v12 = vadd.f32 %v670_v29, %v656_v28 }
 0x22f   : > { %v691_v6 = vpop.permute.xlu1 %690  ;;  %v687_v41 = vadd.f32 %v685_v13, %v671_v7  ;;  %v688_v45 = vadd.f32 %v686_v36, %v672_v12 }
 0x230   : > { %v701_v47 = vmul.f32 %v696_v37, %v691_v6  ;;  %v702_v54 = vmul.f32 %v700_v38, %v691_v6 }
 0x232   : > { %v703_v40 = vadd.f32 %v701_v47, %v687_v41  ;;  %v704_v35 = vadd.f32 %v702_v54, %v688_v45 }
 0x234   : > { %v707_v58 = vpop.permute.xlu1 %706 }
 0x235   : > { %v717_v59 = vmul.f32 %v712_v56, %v707_v58  ;;  %v718_v60 = vmul.f32 %v716_v57, %v707_v58 }
 0x237   : > { %v719_v61 = vadd.f32 %v717_v59, %v703_v40  ;;  %v720_v33 = vadd.f32 %v718_v60, %v704_v35 }
 0x239   : > { %v723_v39 = vcombine.low %v719_v61, %v720_v33 }
 0x23b   : > { %v725_v44 = vadd.f32 %v723_v39, %v1043_v3 }
 0x23d   : > { %726 = vst [vmem:[%s305_s14] sm:$0x77] %v725_v44 }
 0x23e PF: > { %s18_s27 = sadd.s32 1, %s843_s27  }
 0x23f   : > { %p15_p4 = scmp.ge.s32.totalorder %s18_s27, 4  }
 0x241   :  { %17 = sbr.rel (!%p15_p4) target bundleno = 1 (0x1), region = 82 }

</bundles_post_ra>
